<compile_context>
chip_gen: v6e
topology: v6e:2x2x1
jax: 0.10.0
libtpu: 0.0.40
codegen_flags: <defaults>
</compile_context>

<pallas_src>
import functools

import jax
import jax.numpy as jnp
from jax.experimental import pallas as pl
from jax.experimental.pallas import tpu as pltpu


_CHUNK_ROWS = 512                    # rows processed per in-kernel loop step
_VMEM_BLOCK_BUDGET = 36 * 1024 * 1024   # 2 inputs x 2 pipeline buffers of blocks
_VMEM_LIMIT_BYTES = 48 * 1024 * 1024    # safe on v5e/v6e (128 MiB) and v7x (64 MiB)


def _round_up(x, m):
    return -(-x // m) * m


def _num_tensorcores():
    """Best-effort TensorCore count (2 on v7x, 1 on v5e/v6e).

    Defaults to 2, which is always correct: on a 1-TC chip the extra part just
    runs sequentially and any surplus grid steps contribute 0.
    """
    try:
        info = pltpu.get_tpu_info()
        for name in ("num_cores", "core_count", "tensorcore_count",
                     "num_tensorcores", "cores_per_chip"):
            v = getattr(info, name, None)
            if isinstance(v, int) and v > 0:
                return min(v, 2)
    except Exception:
        pass
    return 2


def _nll_partial_sum_kernel(pred_ref, tgt_ref, out_ref, acc_ref, *, fold, chunk_rows):
    """Accumulate sum_i pred[i, target[i]] for this part's row range."""
    t = pl.program_id(1)

    @pl.when(t == 0)
    def _init():
        acc_ref[...] = jnp.zeros_like(acc_ref)

    tile_rows, w = pred_ref.shape
    num_chunks = tile_rows // chunk_rows      # static; tile is a multiple of chunk

    # Loop-invariant lane index (hoisted out of the loop on purpose).
    col = jax.lax.broadcasted_iota(jnp.int32, (chunk_rows, w), 1)

    def body(i, carry):
        r0 = pl.multiple_of(i * chunk_rows, chunk_rows)
        pred = pred_ref[pl.ds(r0, chunk_rows), :]        # (chunk, W) native dtype
        tgt = tgt_ref[pl.ds(r0, chunk_rows), :]          # (chunk, fold) int32
        # One-hot select via compares + vsel (no gather on the TPU vector path).
        # Padded rows carry target == -1 and therefore match no lane.
        mask = col == tgt[:, 0:1]
        for k in range(1, fold):                         # static unroll, fold <= 16
            mask = jnp.logical_or(mask, col == tgt[:, k:k + 1])
        picked = jnp.where(mask, pred, jnp.zeros_like(pred)).astype(jnp.float32)
        acc_ref[...] += jnp.sum(picked, axis=0, keepdims=True)   # (1, W) f32
        return carry

    jax.lax.fori_loop(0, num_chunks, body, 0)

    @pl.when(t == pl.num_programs(1) - 1)
    def _finalize():
        out_ref[...] = jnp.reshape(jnp.sum(acc_ref[...], keepdims=True), (1, 1, 1))


def combined_loss(pred, target, trans_feat=None, *, max_tile_rows=None, num_parts=None):
    """pred: (N, C) float log-probs; target: (N,) int labels; trans_feat unused."""
    del trans_feat  # not used by the reference forward pass
    n, c = pred.shape
    itemsize = jnp.dtype(pred.dtype).itemsize

    # ---- Lane-dense fold factor (free, row-major reshape; never copies pred).
    g = 1
    if c < 128 and 128 % c == 0:
        cand = 128 // c
        if cand <= 16 and n % cand == 0:
            g = cand
    w = g * c
    rows = n // g

    pred2 = pred.reshape(rows, w) if g > 1 else pred
    tgt = target.astype(jnp.int32)
    if g > 1:
        # Pre-offset labels into folded-lane coordinates: lane = k*C + label.
        tgt2 = tgt.reshape(rows, g) + (jnp.arange(g, dtype=jnp.int32) * c)[None, :]
    else:
        tgt2 = tgt.reshape(rows, 1)

    # ---- Tile rows: biggest block whose double-buffered inputs fit the budget.
    pred_row_vmem = _round_up(w, 128) * itemsize
    tgt_row_vmem = 128 * 4                 # (tile, g) int32 lane-pads to 128 lanes
    max_tile = max(8, (_VMEM_BLOCK_BUDGET // (2 * (pred_row_vmem + tgt_row_vmem))) // 8 * 8)
    if max_tile_rows is not None:
        max_tile = max(8, (max_tile_rows // 8) * 8)
    tile = min(max_tile, _round_up(rows, 8))
    chunk = min(_CHUNK_ROWS, tile)
    tile = (tile // chunk) * chunk         # multiple of the in-kernel chunk size

    tiles_needed = -(-rows // tile)
    if num_parts is None:
        n_tc = _num_tensorcores()
        num_parts = n_tc if (n_tc > 1 and tiles_needed >= n_tc) else 1
    tiles_per_part = -(-tiles_needed // num_parts)
    grid_rows = num_parts * tiles_per_part * tile

    # Only the tiny target array is ever padded; rows past N hold -1 so ragged /
    # clamped-extra blocks contribute exactly 0 regardless of pred contents.
    if grid_rows != rows:
        tgt2 = jnp.pad(tgt2, ((0, grid_rows - rows), (0, 0)), constant_values=-1)

    last_block = tiles_needed - 1
    tpp = tiles_per_part
    kernel = functools.partial(_nll_partial_sum_kernel, fold=g, chunk_rows=chunk)

    partials = pl.pallas_call(
        kernel,
        out_shape=jax.ShapeDtypeStruct((num_parts, 1, 1), jnp.float32),
        grid_spec=pltpu.PrefetchScalarGridSpec(
            num_scalar_prefetch=0,
            grid=(num_parts, tiles_per_part),
            in_specs=[
                # Clamp so surplus grid steps re-read the last real block
                # (their targets are all -1, so they add 0) -> no fully-OOB DMA.
                pl.BlockSpec((tile, w),
                             lambda p, t: (jnp.minimum(p * tpp + t, last_block), 0)),
                pl.BlockSpec((tile, g), lambda p, t: (p * tpp + t, 0)),
            ],
            out_specs=pl.BlockSpec((1, 1, 1), lambda p, t: (p, 0, 0)),
            scratch_shapes=[pltpu.VMEM((1, w), jnp.float32)],
        ),
        compiler_params=pltpu.CompilerParams(
            dimension_semantics=("parallel", "arbitrary"),
            vmem_limit_bytes=_VMEM_LIMIT_BYTES,
        ),
    )(pred2, tgt2)

    # Final combine + mean over the true (unpadded) N, once, in the wrapper.
    return (-jnp.sum(partials) / jnp.float32(n)).astype(pred.dtype)


if __name__ == "__main__":
    key = jax.random.PRNGKey(0)
    k1, k2, k3, k4, k5, k6, k7 = jax.random.split(key, 7)

    def ref_nll(p, t):
        return -jnp.mean(jnp.take_along_axis(p, t[:, None], axis=1))

    # Case 1: small batch, C=16 -> lane-dense folded path (g=8), single tile.
    N, C = 8, 16
    pred = jax.nn.log_softmax(jax.random.normal(k1, (N, C), jnp.float32), axis=-1)
    target = jax.random.randint(k2, (N,), 0, C, dtype=jnp.int32)
    trans_feat = jax.random.normal(k3, (N, 3, 3), jnp.float32)  # unused by forward
    loss = jax.block_until_ready(combined_loss(pred, target, trans_feat))
    ref = ref_nll(pred, target)
    assert jnp.allclose(loss, ref, atol=1e-5, rtol=1e-5), (loss, ref)

    # Case 2: ragged N (not a multiple of 8) -> unfolded fallback; tiny forced
    # tiles + forced 2-part split exercise the accumulator, the ragged last
    # block, the target -1 padding and the clamped surplus grid steps.
    N2 = 100
    pred2 = jax.nn.log_softmax(jax.random.normal(k4, (N2, C), jnp.float32), axis=-1)
    target2 = jax.random.randint(k5, (N2,), 0, C, dtype=jnp.int32)
    loss2 = jax.block_until_ready(
        combined_loss(pred2, target2, None, max_tile_rows=8, num_parts=2))
    ref2 = ref_nll(pred2, target2)
    assert jnp.allclose(loss2, ref2, atol=1e-5, rtol=1e-5), (loss2, ref2)

    # Case 3: PointNet++-like shapes (batch=24, 40 classes) -> unfolded, 1 tile.
    N3, C3 = 24, 40
    pred3 = jax.nn.log_softmax(jax.random.normal(k6, (N3, C3), jnp.float32), axis=-1)
    target3 = jax.random.randint(k7, (N3,), 0, C3, dtype=jnp.int32)
    loss3 = jax.block_until_ready(combined_loss(pred3, target3, None))
    ref3 = ref_nll(pred3, target3)
    assert jnp.allclose(loss3, ref3, atol=1e-5, rtol=1e-5), (loss3, ref3)

    print("KERNEL_OK")
</pallas_src>

<mosaic_0001>
module attributes {stable_mosaic.version = 11 : i64} {
  func.func @_nll_partial_sum_kernel(%arg0: i32, %arg1: i32, %arg2: memref<8x128xf32, #tpu.memory_space<vmem>>, %arg3: memref<8x8xi32, #tpu.memory_space<vmem>>, %arg4: memref<1x1x1xf32, #tpu.memory_space<vmem>>, %arg5: memref<1x128xf32, #tpu.memory_space<vmem>>) attributes {dimension_semantics = [#tpu.dimension_semantics<parallel>, #tpu.dimension_semantics<arbitrary>], iteration_bounds = array<i64: 1, 1>, scalar_prefetch = 0 : i64, scratch_operands = 1 : i64, tpu.core_type = #tpu.core_type<tc>, window_params = [{transform_indices = @transform_0, window_bounds = array<i64: 8, 128>}, {transform_indices = @transform_1, window_bounds = array<i64: 8, 8>}, {transform_indices = @transform_2, window_bounds = array<i64: 1, 1, 1>}]} {
    %c0_i32 = arith.constant 0 : i32
    %0 = arith.cmpi eq, %arg1, %c0_i32 : i32
    %1 = arith.extui %0 : i1 to i32
    %c0_i32_0 = arith.constant 0 : i32
    %2 = arith.cmpi ne, %1, %c0_i32_0 : i32
    scf.if %2 {
      %cst_10 = arith.constant 0.000000e+00 : f32
      %51 = vector.broadcast %cst_10 : f32 to vector<1x128xf32>
      %c0_11 = arith.constant 0 : index
      %c0_12 = arith.constant 0 : index
      %52 = vector.load %arg5[%c0_11, %c0_12] : memref<1x128xf32, #tpu.memory_space<vmem>>, vector<1x128xf32>
      tpu.vector_store %arg5[%c0_11, %c0_12], %51 {strides = array<i32>} : memref<1x128xf32, #tpu.memory_space<vmem>>, vector<1x128xf32>,
    } else {
    }
    %3 = tpu.iota {dimensions = array<i32: 1>} : vector<8x128xi32>
    %c0_i32_1 = arith.constant 0 : i32
    %c8_i32 = arith.constant 8 : i32
    %4 = arith.muli %c0_i32_1, %c8_i32 : i32
    %5 = tpu.assume_multiple %4, 8 : i32
    %6 = arith.index_cast %5 : i32 to index
    %c0 = arith.constant 0 : index
    %7 = vector.load %arg2[%6, %c0] : memref<8x128xf32, #tpu.memory_space<vmem>>, vector<8x128xf32>
    %8 = arith.index_cast %5 : i32 to index
    %c0_2 = arith.constant 0 : index
    %9 = vector.load %arg3[%8, %c0_2] : memref<8x8xi32, #tpu.memory_space<vmem>>, vector<8x8xi32>
    %10 = vector.extract_strided_slice %9 {offsets = [0, 0], sizes = [8, 1], strides = [1, 1]} : vector<8x8xi32> to vector<8x1xi32>
    %11 = vector.broadcast %10 : vector<8x1xi32> to vector<8x128xi32>
    %12 = arith.cmpi eq, %3, %11 : vector<8x128xi32>
    %13 = vector.extract_strided_slice %9 {offsets = [0, 1], sizes = [8, 1], strides = [1, 1]} : vector<8x8xi32> to vector<8x1xi32>
    %14 = vector.broadcast %13 : vector<8x1xi32> to vector<8x128xi32>
    %15 = arith.cmpi eq, %3, %14 : vector<8x128xi32>
    %16 = arith.ori %12, %15 : vector<8x128xi1>
    %17 = vector.extract_strided_slice %9 {offsets = [0, 2], sizes = [8, 1], strides = [1, 1]} : vector<8x8xi32> to vector<8x1xi32>
    %18 = vector.broadcast %17 : vector<8x1xi32> to vector<8x128xi32>
    %19 = arith.cmpi eq, %3, %18 : vector<8x128xi32>
    %20 = arith.ori %16, %19 : vector<8x128xi1>
    %21 = vector.extract_strided_slice %9 {offsets = [0, 3], sizes = [8, 1], strides = [1, 1]} : vector<8x8xi32> to vector<8x1xi32>
    %22 = vector.broadcast %21 : vector<8x1xi32> to vector<8x128xi32>
    %23 = arith.cmpi eq, %3, %22 : vector<8x128xi32>
    %24 = arith.ori %20, %23 : vector<8x128xi1>
    %25 = vector.extract_strided_slice %9 {offsets = [0, 4], sizes = [8, 1], strides = [1, 1]} : vector<8x8xi32> to vector<8x1xi32>
    %26 = vector.broadcast %25 : vector<8x1xi32> to vector<8x128xi32>
    %27 = arith.cmpi eq, %3, %26 : vector<8x128xi32>
    %28 = arith.ori %24, %27 : vector<8x128xi1>
    %29 = vector.extract_strided_slice %9 {offsets = [0, 5], sizes = [8, 1], strides = [1, 1]} : vector<8x8xi32> to vector<8x1xi32>
    %30 = vector.broadcast %29 : vector<8x1xi32> to vector<8x128xi32>
    %31 = arith.cmpi eq, %3, %30 : vector<8x128xi32>
    %32 = arith.ori %28, %31 : vector<8x128xi1>
    %33 = vector.extract_strided_slice %9 {offsets = [0, 6], sizes = [8, 1], strides = [1, 1]} : vector<8x8xi32> to vector<8x1xi32>
    %34 = vector.broadcast %33 : vector<8x1xi32> to vector<8x128xi32>
    %35 = arith.cmpi eq, %3, %34 : vector<8x128xi32>
    %36 = arith.ori %32, %35 : vector<8x128xi1>
    %37 = vector.extract_strided_slice %9 {offsets = [0, 7], sizes = [8, 1], strides = [1, 1]} : vector<8x8xi32> to vector<8x1xi32>
    %38 = vector.broadcast %37 : vector<8x1xi32> to vector<8x128xi32>
    %39 = arith.cmpi eq, %3, %38 : vector<8x128xi32>
    %40 = arith.ori %36, %39 : vector<8x128xi1>
    %cst = arith.constant 0.000000e+00 : f32
    %41 = vector.broadcast %cst : f32 to vector<8x128xf32>
    %42 = arith.select %40, %7, %41 : vector<8x128xi1>, vector<8x128xf32>
    %c0_3 = arith.constant 0 : index
    %c0_4 = arith.constant 0 : index
    %43 = vector.load %arg5[%c0_3, %c0_4] : memref<1x128xf32, #tpu.memory_space<vmem>>, vector<1x128xf32>
    %cst_5 = arith.constant dense<0.000000e+00> : vector<128xf32>
    %44 = vector.multi_reduction <add>, %42, %cst_5 [0] : vector<8x128xf32> to vector<128xf32>
    %45 = vector.shape_cast %44 : vector<128xf32> to vector<1x128xf32>
    %46 = arith.addf %43, %45 : vector<1x128xf32>
    %c0_6 = arith.constant 0 : index
    %c0_7 = arith.constant 0 : index
    %47 = vector.load %arg5[%c0_6, %c0_7] : memref<1x128xf32, #tpu.memory_space<vmem>>, vector<1x128xf32>
    tpu.vector_store %arg5[%c0_6, %c0_7], %46 {strides = array<i32>} : memref<1x128xf32, #tpu.memory_space<vmem>>, vector<1x128xf32>,
    %c1_i32 = arith.constant 1 : i32
    %c0_i32_8 = arith.constant 0 : i32
    %48 = arith.cmpi eq, %arg1, %c0_i32_8 : i32
    %49 = arith.extui %48 : i1 to i32
    %c0_i32_9 = arith.constant 0 : i32
    %50 = arith.cmpi ne, %49, %c0_i32_9 : i32
    scf.if %50 {
      %c0_10 = arith.constant 0 : index
      %c0_11 = arith.constant 0 : index
      %51 = vector.load %arg5[%c0_10, %c0_11] : memref<1x128xf32, #tpu.memory_space<vmem>>, vector<1x128xf32>
      %52 = vector.shape_cast %51 : vector<1x128xf32> to vector<1x1x128xf32>
      %cst_12 = arith.constant dense<0.000000e+00> : vector<1xf32>
      %53 = vector.multi_reduction <add>, %52, %cst_12 [1, 2] : vector<1x1x128xf32> to vector<1xf32>
      %54 = vector.shape_cast %53 : vector<1xf32> to vector<1x1x1xf32>
      %55 = vector.extract %54[0, 0, 0] : f32 from vector<1x1x1xf32>
      %56 = vector.broadcast %55 : f32 to vector<1x1xf32>
      %57 = vector.shape_cast %56 : vector<1x1xf32> to vector<1x1x1xf32>
      %c0_13 = arith.constant 0 : index
      %c0_14 = arith.constant 0 : index
      %c0_15 = arith.constant 0 : index
      %58 = vector.load %arg4[%c0_13, %c0_14, %c0_15] : memref<1x1x1xf32, #tpu.memory_space<vmem>>, vector<1x1x1xf32>
      tpu.vector_store %arg4[%c0_13, %c0_14, %c0_15], %57 {strides = array<i32>} : memref<1x1x1xf32, #tpu.memory_space<vmem>>, vector<1x1x1xf32>,
    } else {
    }
    return
  }
  func.func @transform_0(%arg0: i32, %arg1: i32) -> (i32, i32) {
    %c1_i32 = arith.constant 1 : i32
    %0 = arith.muli %arg0, %c1_i32 : i32
    %1 = arith.addi %0, %arg1 : i32
    %c0_i32 = arith.constant 0 : i32
    %2 = arith.minsi %1, %c0_i32 : i32
    %c0_i32_0 = arith.constant 0 : i32
    %c0_i32_1 = arith.constant 0 : i32
    return %2, %c0_i32_0 : i32, i32
  }
  func.func @transform_1(%arg0: i32, %arg1: i32) -> (i32, i32) {
    %c1_i32 = arith.constant 1 : i32
    %0 = arith.muli %arg0, %c1_i32 : i32
    %1 = arith.addi %0, %arg1 : i32
    %c0_i32 = arith.constant 0 : i32
    %c0_i32_0 = arith.constant 0 : i32
    return %1, %c0_i32 : i32, i32
  }
  func.func @transform_2(%arg0: i32, %arg1: i32) -> (i32, i32, i32) {
    %c0_i32 = arith.constant 0 : i32
    %c0_i32_0 = arith.constant 0 : i32
    %c0_i32_1 = arith.constant 0 : i32
    return %arg0, %c0_i32, %c0_i32_0 : i32, i32, i32
  }
}

</mosaic_0001>

<bundles_post_ra>
// kernel: tpu_custom_call.1
= control target key start
LH: loop header
LB: loop body
LE: loop exit
PB: predicated region body
PF: predicated region fallthrough
CT: control target
= control target key end

     0   :  { %7 = vsyncpa [#allocation4], 0  ;;  %s280_s0 = inlined_call_operand.hbm [shape: f32[1,128], index: 0, kind: input, shape index: {}]   ;;  %s281_s1 = inlined_call_operand.hbm [shape: s32[8,8], index: 1, kind: input, shape index: {}]   ;;  %s282_s2 = inlined_call_operand.hbm [shape: f32[1,1,1], index: 2, kind: output, shape index: {}]  }
   0x1   :  { %8 = vsyncpa [#allocation7], 0 }
   0x2   :  { %9 = vsyncpa [#allocation5], 0 }
   0x3   :  { %20 = vsyncadd [#allocation4], 112  ;;  %s242_s9 = smov [#allocation3]  }
   0x4   :  { %s24_s10 = sshll.u32 %s242_s9, 4  ;;  %s25_s10 = int_to_ptr.vmem [resolvable:$true] %s24_s10 }
   0x5   :  { %s184_s11 = scalar_lea.vmem %s25_s10, 16  ;;  %s188_s12 = scalar_lea.vmem %s25_s10, 128 }
   0x6   :  { %p185_p0 = scmp.ne.s32.totalorder %s25_s10, %s184_s11  ;;  %p189_p1 = scmp.lt.s32.totalorder %s25_s10, %s25_s10 }
   0x7   :  { %p190_p2 = scmp.lt.s32.totalorder %s188_s12, %s184_s11 }
   0x9   :  { %p191_p3 = por %p190_p2, %p189_p1 }
   0xb   :  { %p192_p4 = pnand %p191_p3, %p185_p0 }
   0xd   :  { %195 = shalt.err (!%p192_p4)
}
   0xe   :  { %s243_s13 = smov 16   ;;  %s244_s14 = smov 1  }
   0xf   :  { %30 = dma.hbm_to_vmem [thread:$0]  %s280_s0, 16, %s25_s10, [#allocation4], %s243_s13, %s243_s13, %s244_s14  }
  0x10   :  { %s245_s17 = smov [#allocation6]  }
  0x11   :  { %s40_s18 = sshll.u32 %s245_s17, 4  ;;  %s41_s18 = int_to_ptr.vmem [resolvable:$true] %s40_s18 }
  0x12   :  { %s204_s19 = scalar_lea.vmem %s41_s18, 128  ;;  %p209_p6 = scmp.lt.s32.totalorder %s41_s18, %s41_s18 }
  0x13   :  { %p205_p5 = scmp.ne.s32.totalorder %s41_s18, %s204_s19  ;;  %p210_p7 = scmp.lt.s32.totalorder %s204_s19, %s204_s19 }
  0x15   :  { %p211_p8 = por %p210_p7, %p209_p6 }
  0x17   :  { %p212_p9 = pnand %p211_p8, %p205_p5 }
  0x19   :  { %215 = shalt.err (!%p212_p9)
}
  0x1a   :  { %43 = dma.hbm_to_vmem [thread:$0]  %s281_s1, 128, %s41_s18, [#allocation7]  }
  0x1b   :  { %236 = dma.done.wait [#allocation4], 128  }
  0x1c   :  { %237 = vsyncadd [#allocation4], 4294967168 }
  0x1d   :  { %238 = dma.done.wait [#allocation7], 128  }
  0x1e   :  { %239 = vsyncadd [#allocation7], 4294967168  ;;  %v246_v0 = vmov 0.0   ;;  %v247_v1 = vmov 2   ;;  %v248_v2 = vmov 0   ;;  %v65_v3 = vld [vmem:[#allocation6] sm:$0xff]  ;;  %v62_v12 = vlaneseq }
  0x1f   :  { %61 = vst [vmem:[#allocation2] sm:$0x1] %v246_v0  ;;  %169 = vset.pattern.permute.xlu1 %v247_v1  ;;  %167 = vset.pattern.permute.xlu0 %v248_v2  ;;  %v249_v4 = vmov 3   ;;  %v250_v5 = vmov 1   ;;  %v251_v6 = vmov 4   ;;  %v252_v7 = vmov 5  }
  0x20   :  { %76 = vperm.xlu1 %169, %v65_v3   ;;  %67 = vperm.xlu0 %167, %v65_v3   ;;  %v253_v8 = vmov 6   ;;  %v254_v9 = vmov 7   ;;  %v63_v13 = vand.u32 127, %v62_v12  ;;  %v64_v20 = vld [vmem:[#allocation3] sm:$0xff]  ;;  %vm119_vm15 = vcmask 1040384   ;;  %s255_s0 = smov [#allocation8]  }
  0x21   :  { %s139_s1 = sshll.u32 %s255_s0, 4  ;;  %s140_s1 = int_to_ptr.vmem [resolvable:$true] %s139_s1 }
  0x22   :  { %s216_s23 = scalar_lea.vmem %s140_s1, 16  ;;  %s220_s24 = scalar_lea.vmem %s140_s1, 32 }
  0x23   :  { %p217_p10 = scmp.ne.s32.totalorder %s140_s1, %s216_s23  ;;  %p221_p11 = scmp.lt.s32.totalorder %s140_s1, %s140_s1 }
  0x24   :  { %170 = vset.pattern.permute.xlu1 %v249_v4  ;;  %168 = vset.pattern.permute.xlu0 %v250_v5  ;;  %p222_p12 = scmp.lt.s32.totalorder %s220_s24, %s216_s23 }
  0x25   :  { %81 = vperm.xlu1 %170, %v65_v3   ;;  %71 = vperm.xlu0 %168, %v65_v3  }
  0x26   :  { %v106_v27 = vld [vmem:[#allocation2] sm:$0x1]  ;;  %p223_p13 = por %p222_p12, %p221_p11 }
  0x28   :  { %p224_p0 = pnand %p223_p13, %p217_p10 }
  0x29   :  { %171 = vset.pattern.permute.xlu1 %v251_v6  ;;  %172 = vset.pattern.permute.xlu0 %v252_v7 }
  0x2a   :  { %86 = vperm.xlu1 %171, %v65_v3   ;;  %91 = vperm.xlu0 %172, %v65_v3  }
  0x2e   :  { %173 = vset.pattern.permute.xlu1 %v253_v8  ;;  %175 = vset.pattern.permute.xlu0 %v254_v9 }
  0x2f   :  { %96 = vperm.xlu1 %173, %v65_v3  }
  0x33   :  { %174 = vset.pattern.permute.xlu1 %v254_v9 }
  0x34   :  { %101 = vperm.xlu1 %174, %v65_v3  }
  0x9b   :  { %v77_v10 = vpop.permute.xlu1 %76  ;;  %v68_v11 = vpop.permute.xlu0 %67 }
  0x9c   :  { %vm69_vm0 = vcmp.eq.s32.totalorder %v63_v13, %v68_v11  ;;  %vm78_vm3 = vcmp.eq.s32.totalorder %v63_v13, %v77_v10 }
  0xa0   :  { %v82_v14 = vpop.permute.xlu1 %81  ;;  %v72_v15 = vpop.permute.xlu0 %71 }
  0xa1   :  { %vm73_vm1 = vcmp.eq.s32.totalorder %v63_v13, %v72_v15  ;;  %vm83_vm6 = vcmp.eq.s32.totalorder %v63_v13, %v82_v14 }
  0xa2   :  { %vm74_vm2 = vmor %vm69_vm0, %vm73_vm1  ;;  %vm131_vm0 = vcmask 0  }
  0xa3   :  { %vm79_vm4 = vmor %vm74_vm2, %vm78_vm3 }
  0xa4   :  { %vm84_vm7 = vmor %vm79_vm4, %vm83_vm6 }
  0xa5   :  { %v87_v16 = vpop.permute.xlu1 %86  ;;  %v92_v17 = vpop.permute.xlu0 %91 }
  0xa6   :  { %vm88_vm5 = vcmp.eq.s32.totalorder %v63_v13, %v87_v16  ;;  %vm93_vm9 = vcmp.eq.s32.totalorder %v63_v13, %v92_v17 }
  0xa7   :  { %vm89_vm8 = vmor %vm84_vm7, %vm88_vm5 }
  0xa8   :  { %vm94_vm11 = vmor %vm89_vm8, %vm93_vm9 }
  0xaa   :  { %v97_v18 = vpop.permute.xlu1 %96 }
  0xab   :  { %vm98_vm10 = vcmp.eq.s32.totalorder %v63_v13, %v97_v18 }
  0xac   :  { %vm99_vm12 = vmor %vm94_vm11, %vm98_vm10 }
  0xaf   :  { %v102_v19 = vpop.permute.xlu1 %101 }
  0xb0   :  { %vm103_vm13 = vcmp.eq.s32.totalorder %v63_v13, %v102_v19 }
  0xb1   :  { %vm104_vm14 = vmor %vm99_vm12, %vm103_vm13 }
  0xb2   :  { %v105_v21 = vsel %vm104_vm14, %v64_v20, 0.0 }
  0xb3   :  { %v107_v22 = vrot.slane %v105_v21, 4 }
  0xb5   :  { %v108_v23 = vadd.f32 %v107_v22, %v105_v21 }
  0xb7   :  { %v109_v24 = vrot.slane %v108_v23, 2 }
  0xb9   :  { %v110_v25 = vadd.f32 %v109_v24, %v108_v23 }
  0xbb   :  { %v111_v26 = vrot.slane %v110_v25, 1 }
  0xbd   :  { %v112_v28 = vadd.f32 %v111_v26, %v110_v25 }
  0xbf   :  { %v113_v29 = vadd.f32 %v112_v28, %v106_v27 }
  0xc1   :  { %114 = vst [vmem:[#allocation2] sm:$0x1] %v113_v29 }
  0xc8   :  { %v118_v30 = vld [vmem:[#allocation2] sm:$0x1] }
  0xc9   :  { %v120_v31 = vsel %vm119_vm15, %v118_v30, 0.0 }
  0xca   :  { %121 = vadd.xlane.f32.xlu0 %v120_v31 }
 0x153   :  { %v122_v32 = vpop.xlane.xlu0 %121 }
 0x154   :  { %v123_v33 = vrot.slane %v122_v32, 4 }
 0x156   :  { %v124_v34 = vadd.f32 %v123_v33, %v122_v32 }
 0x158   :  { %v125_v35 = vrot.slane %v124_v34, 2 }
 0x15a   :  { %v126_v36 = vadd.f32 %v125_v35, %v124_v34 }
 0x15c   :  { %v127_v37 = vrot.slane %v126_v36, 1 }
 0x15e   :  { %v128_v38 = vadd.f32 %v127_v37, %v126_v36 }
 0x160   :  { %151 = vpush %v128_v38 }
 0x191   :  { %s152_s22 = spop %151 }
 0x192   :  { %v130_v39 = vstv %s152_s22 }
 0x193   :  { %132 = vst.msk [vmem:[#allocation8] sm:$0x1] %vm131_vm0, %v130_v39 }
 0x194   :  { %227 = shalt.err (!%p224_p0)
}
 0x195   :  { %142 = dma.vmem_to_hbm [thread:$0]  %s140_s1, 16, %s282_s2, [#allocation5]  }
 0x196   :  { %240 = dma.done.wait [#allocation5], 16  }
 0x197   :  { %241 = vsyncadd [#allocation5], 4294967280 }
 0x198   :  { %146 = vsyncpa [#allocation4], 1 }
 0x199   :  { %147 = vsyncpa [#allocation7], 1 }
 0x19a   :  { %148 = vsyncpa [#allocation5], 1 }

</bundles_post_ra>
